<compile_context>
chip_gen: v7x
topology: tpu7x:2x2x1
jax: 0.10.0
libtpu: 0.0.40
codegen_flags: <defaults>
</compile_context>

<pallas_src>
import functools

import jax
import jax.numpy as jnp
from jax.experimental import pallas as pl
from jax.experimental.pallas import tpu as pltpu

LANE = 128  # TPU lane width; hidden / action feature dims are padded to this


def _elu(x):
    # ELU(alpha=1): x if x > 0 else exp(x) - 1.
    # exp() is evaluated on min(x, 0) so the discarded positive branch never overflows.
    return jnp.where(x > 0, x, jnp.exp(jnp.minimum(x, 0.0)) - 1.0)


def rl_player_kernel(obs_ref, vec_ref, w_ref, out_ref, *, num_obs):
    """1 FMA-normalize + clip, 4 bf16 MXU matmuls (f32 accum), 3 ELUs, final clamp.

    obs_ref : (Bt, num_obs) f32   observations (no lane padding on the input)
    vec_ref : (6, 128)      f32   rows = [norm_scale, norm_shift, b1, b2, b3, b_mu]
    w_ref   : (4, 128, 128) bf16  padded [w1, w2, w3, w_mu]
    out_ref : (Bt, 128)     f32   padded actions (real actions in first num_actions lanes)
    """
    x = obs_ref[...]

    # --- running-mean-std normalization, folded to a single multiply-add + clip (f32) ---
    scale = vec_ref[0:1, :num_obs]
    shift = vec_ref[1:2, :num_obs]
    x = jnp.clip(x * scale + shift, -5.0, 5.0)

    # --- actor MLP (Linear + ELU); bf16 operands into the MXU, f32 accumulation ---
    w1 = w_ref[0, :num_obs, :]                      # (num_obs, 128) bf16 static view
    h = _elu(jnp.dot(x.astype(jnp.bfloat16), w1,
                     preferred_element_type=jnp.float32) + vec_ref[2:3, :])
    h = _elu(jnp.dot(h.astype(jnp.bfloat16), w_ref[1],
                     preferred_element_type=jnp.float32) + vec_ref[3:4, :])
    h = _elu(jnp.dot(h.astype(jnp.bfloat16), w_ref[2],
                     preferred_element_type=jnp.float32) + vec_ref[4:5, :])

    # --- mu head + deterministic action clamp to action space [-1, 1] ---
    mu = jnp.dot(h.astype(jnp.bfloat16), w_ref[3],
                 preferred_element_type=jnp.float32) + vec_ref[5:6, :]
    out_ref[...] = jnp.clip(mu, -1.0, 1.0)


def pack_params(params):
    """One-time packing: fold norm constants, pad to lane-dense slabs, bf16 weights."""
    (mean, var, w1, b1, w2, b2, w3, b3, wmu, bmu) = params

    def pad_row(v):
        v = v.reshape(-1).astype(jnp.float32)
        assert v.shape[0] <= LANE, "feature dim must be <= 128 for this packing"
        return jnp.pad(v, (0, LANE - v.shape[0]))

    def pad_mat(w):
        w = w.astype(jnp.float32)
        assert w.shape[0] <= LANE and w.shape[1] <= LANE
        return jnp.pad(w, ((0, LANE - w.shape[0]), (0, LANE - w.shape[1])))

    inv_std = jax.lax.rsqrt(var + 1e-5)       # hoisted out of the kernel (runs once)
    scale = pad_row(inv_std)                  # padded lanes -> 0 (never read in-kernel)
    shift = pad_row(-mean * inv_std)

    vec_slab = jnp.stack(
        [scale, shift, pad_row(b1), pad_row(b2), pad_row(b3), pad_row(bmu)])      # (6,128) f32
    w_slab = jnp.stack(
        [pad_mat(w1), pad_mat(w2), pad_mat(w3), pad_mat(wmu)]).astype(jnp.bfloat16)  # (4,128,128) bf16
    return vec_slab, w_slab


def rl_player_forward(obs, packed_params, num_actions, tile_b=1024):
    """obs (B, num_obs) -> normalized actions (B, num_actions)."""
    vec_slab, w_slab = packed_params
    B, num_obs = obs.shape
    assert num_obs <= LANE and num_actions <= LANE
    obs = obs.astype(jnp.float32)

    kernel = functools.partial(rl_player_kernel, num_obs=num_obs)

    if B >= tile_b and B % tile_b == 0:
        # Large-batch path: 1-D grid over batch, double-buffered obs/out tiles,
        # weight/vec slabs VMEM-resident (constant index_map), batch axis parallel
        # so v7x's two TensorCores shard it.
        out_p = pl.pallas_call(
            kernel,
            out_shape=jax.ShapeDtypeStruct((B, LANE), jnp.float32),
            grid=(B // tile_b,),
            in_specs=[
                pl.BlockSpec((tile_b, num_obs), lambda i: (i, 0)),
                pl.BlockSpec((6, LANE), lambda i: (0, 0)),
                pl.BlockSpec((4, LANE, LANE), lambda i: (0, 0, 0)),
            ],
            out_specs=pl.BlockSpec((tile_b, LANE), lambda i: (i, 0)),
            compiler_params=pltpu.CompilerParams(
                dimension_semantics=("parallel",)),
        )(obs, vec_slab, w_slab)
    else:
        # Small-batch path: whole-array VMEM residency, no grid / pipeline overhead.
        out_p = pl.pallas_call(
            kernel,
            out_shape=jax.ShapeDtypeStruct((B, LANE), jnp.float32),
            in_specs=[
                pl.BlockSpec(memory_space=pltpu.MemorySpace.VMEM),
                pl.BlockSpec(memory_space=pltpu.MemorySpace.VMEM),
                pl.BlockSpec(memory_space=pltpu.MemorySpace.VMEM),
            ],
            out_specs=pl.BlockSpec(memory_space=pltpu.MemorySpace.VMEM),
        )(obs, vec_slab, w_slab)

    return out_p[:, :num_actions]


def make_params(key, num_observations, num_actions, hidden=(64, 64, 32)):
    """Deterministic synthetic parameters (stand-in for checkpoint restore)."""
    ks = jax.random.split(key, 12)
    dims = (num_observations,) + tuple(hidden)

    def lin(kw, kb, d_in, d_out, scale):
        w = jax.random.normal(kw, (d_in, d_out), jnp.float32) * scale
        b = jax.random.normal(kb, (1, d_out), jnp.float32) * 0.01
        return w, b

    mean = jax.random.normal(ks[0], (1, num_observations), jnp.float32) * 0.1
    var = jnp.abs(jax.random.normal(ks[1], (1, num_observations), jnp.float32)) + 0.5

    w1, b1 = lin(ks[2], ks[3], dims[0], dims[1], 1.0 / jnp.sqrt(dims[0]))
    w2, b2 = lin(ks[4], ks[5], dims[1], dims[2], 1.0 / jnp.sqrt(dims[1]))
    w3, b3 = lin(ks[6], ks[7], dims[2], dims[3], 1.0 / jnp.sqrt(dims[2]))
    wmu, bmu = lin(ks[8], ks[9], dims[3], num_actions, 1.0 / jnp.sqrt(dims[3]))

    return (mean, var, w1, b1, w2, b2, w3, b3, wmu, bmu)


def reference_forward(obs, params):
    """Exact original (full-f32) semantics."""
    (mean, var, w1, b1, w2, b2, w3, b3, wmu, bmu) = params
    x = jnp.clip((obs - mean) / jnp.sqrt(var + 1e-5), -5.0, 5.0)
    h = _elu(x @ w1 + b1)
    h = _elu(h @ w2 + b2)
    h = _elu(h @ w3 + b3)
    return jnp.clip(h @ wmu + bmu, -1.0, 1.0)


def reference_forward_bf16(obs, params):
    """Numerics-matched reference: folded norm, bf16 operands at each dot, f32 accum."""
    (mean, var, w1, b1, w2, b2, w3, b3, wmu, bmu) = params

    def dot_bf16(a, w):
        return jnp.dot(a.astype(jnp.bfloat16), w.astype(jnp.bfloat16),
                       preferred_element_type=jnp.float32)

    inv_std = jax.lax.rsqrt(var + 1e-5)
    x = jnp.clip(obs * inv_std + (-mean * inv_std), -5.0, 5.0)
    h = _elu(dot_bf16(x, w1) + b1)
    h = _elu(dot_bf16(h, w2) + b2)
    h = _elu(dot_bf16(h, w3) + b3)
    return jnp.clip(dot_bf16(h, wmu) + bmu, -1.0, 1.0)


if __name__ == "__main__":
    num_observations = 32
    num_actions = 8
    batch = 8

    key = jax.random.PRNGKey(0)
    k_obs, k_params, k_obs_big = jax.random.split(key, 3)

    obs = jax.random.normal(k_obs, (batch, num_observations), jnp.float32)
    params = make_params(k_params, num_observations, num_actions)
    packed = pack_params(params)     # one-time: fold norm constants, pad, bf16-pack

    # --- small-batch (grid-less) path ---
    out = jax.block_until_ready(rl_player_forward(obs, packed, num_actions))
    assert out.shape == (batch, num_actions)

    ref_bf16 = reference_forward_bf16(obs, params)     # matches kernel numerics
    ref_f32 = reference_forward(obs, params)           # original full-precision semantics
    assert jnp.allclose(out, ref_bf16, atol=1e-3, rtol=1e-3), "mismatch vs bf16-matched ref"
    assert jnp.allclose(out, ref_f32, atol=5e-2), "mismatch vs f32 reference semantics"

    # --- large-batch (1-D batch grid, pipelined) path ---
    big_batch = 1024
    obs_big = jax.random.normal(k_obs_big, (big_batch, num_observations), jnp.float32)
    out_big = jax.block_until_ready(
        rl_player_forward(obs_big, packed, num_actions, tile_b=512))
    assert out_big.shape == (big_batch, num_actions)
    ref_big = reference_forward_bf16(obs_big, params)
    assert jnp.allclose(out_big, ref_big, atol=1e-3, rtol=1e-3), "mismatch on grid path"

    print("KERNEL_OK")
</pallas_src>

<mosaic_0001>
module attributes {stable_mosaic.version = 11 : i64} {
  func.func @rl_player_kernel(%arg0: memref<8x32xf32, #tpu.memory_space<vmem>>, %arg1: memref<6x128xf32, #tpu.memory_space<vmem>>, %arg2: memref<4x128x128xbf16, #tpu.memory_space<vmem>>, %arg3: memref<8x128xf32, #tpu.memory_space<vmem>>) attributes {dimension_semantics = [], scalar_prefetch = 0 : i64, scratch_operands = 0 : i64, tpu.core_type = #tpu.core_type<tc>} {
    %c0 = arith.constant 0 : index
    %c0_0 = arith.constant 0 : index
    %0 = vector.load %arg0[%c0, %c0_0] : memref<8x32xf32, #tpu.memory_space<vmem>>, vector<8x32xf32>
    %c0_1 = arith.constant 0 : index
    %c0_2 = arith.constant 0 : index
    %1 = vector.load %arg1[%c0_1, %c0_2] : memref<6x128xf32, #tpu.memory_space<vmem>>, vector<1x32xf32>
    %c1 = arith.constant 1 : index
    %c0_3 = arith.constant 0 : index
    %2 = vector.load %arg1[%c1, %c0_3] : memref<6x128xf32, #tpu.memory_space<vmem>>, vector<1x32xf32>
    %3 = vector.broadcast %1 : vector<1x32xf32> to vector<8x32xf32>
    %4 = arith.mulf %0, %3 : vector<8x32xf32>
    %5 = vector.broadcast %2 : vector<1x32xf32> to vector<8x32xf32>
    %6 = arith.addf %4, %5 : vector<8x32xf32>
    %cst = arith.constant -5.000000e+00 : f32
    %cst_4 = arith.constant 5.000000e+00 : f32
    %7 = vector.broadcast %cst : f32 to vector<8x32xf32>
    %8 = arith.maximumf %7, %6 : vector<8x32xf32>
    %9 = vector.broadcast %cst_4 : f32 to vector<8x32xf32>
    %10 = arith.minimumf %9, %8 : vector<8x32xf32>
    %c0_5 = arith.constant 0 : index
    %c0_6 = arith.constant 0 : index
    %c0_7 = arith.constant 0 : index
    %11 = vector.load %arg2[%c0_5, %c0_6, %c0_7] : memref<4x128x128xbf16, #tpu.memory_space<vmem>>, vector<1x32x128xbf16>
    %12 = vector.shape_cast %11 : vector<1x32x128xbf16> to vector<32x128xbf16>
    %13 = arith.truncf %10 : vector<8x32xf32> to vector<8x32xbf16>
    %cst_8 = arith.constant dense<0.000000e+00> : vector<8x128xf32>
    %14 = tpu.matmul %13, %12, %cst_8 {dimension_numbers = #tpu.dot_dimension_numbers<[1], [0], [0], [1], [0, 0, 1, 1], [], []>} : vector<8x32xbf16>, vector<32x128xbf16>, vector<8x128xf32> -> vector<8x128xf32>
    %c2 = arith.constant 2 : index
    %c0_9 = arith.constant 0 : index
    %15 = vector.load %arg1[%c2, %c0_9] : memref<6x128xf32, #tpu.memory_space<vmem>>, vector<1x128xf32>
    %16 = vector.broadcast %15 : vector<1x128xf32> to vector<8x128xf32>
    %17 = arith.addf %14, %16 : vector<8x128xf32>
    %cst_10 = arith.constant 0.000000e+00 : f32
    %18 = vector.broadcast %cst_10 : f32 to vector<8x128xf32>
    %19 = arith.cmpf ogt, %17, %18 : vector<8x128xf32>
    %cst_11 = arith.constant 0.000000e+00 : f32
    %20 = vector.broadcast %cst_11 : f32 to vector<8x128xf32>
    %21 = arith.minimumf %17, %20 : vector<8x128xf32>
    %22 = math.exp %21 : vector<8x128xf32>
    %cst_12 = arith.constant 1.000000e+00 : f32
    %23 = vector.broadcast %cst_12 : f32 to vector<8x128xf32>
    %24 = arith.subf %22, %23 : vector<8x128xf32>
    %25 = arith.select %19, %17, %24 : vector<8x128xi1>, vector<8x128xf32>
    %26 = arith.truncf %25 : vector<8x128xf32> to vector<8x128xbf16>
    %c1_13 = arith.constant 1 : index
    %c0_14 = arith.constant 0 : index
    %c0_15 = arith.constant 0 : index
    %27 = vector.load %arg2[%c1_13, %c0_14, %c0_15] : memref<4x128x128xbf16, #tpu.memory_space<vmem>>, vector<1x128x128xbf16>
    %28 = vector.shape_cast %27 : vector<1x128x128xbf16> to vector<128x128xbf16>
    %cst_16 = arith.constant dense<0.000000e+00> : vector<8x128xf32>
    %29 = tpu.matmul %26, %28, %cst_16 {dimension_numbers = #tpu.dot_dimension_numbers<[1], [0], [0], [1], [0, 0, 1, 1], [], []>} : vector<8x128xbf16>, vector<128x128xbf16>, vector<8x128xf32> -> vector<8x128xf32>
    %c3 = arith.constant 3 : index
    %c0_17 = arith.constant 0 : index
    %30 = vector.load %arg1[%c3, %c0_17] : memref<6x128xf32, #tpu.memory_space<vmem>>, vector<1x128xf32>
    %31 = vector.broadcast %30 : vector<1x128xf32> to vector<8x128xf32>
    %32 = arith.addf %29, %31 : vector<8x128xf32>
    %cst_18 = arith.constant 0.000000e+00 : f32
    %33 = vector.broadcast %cst_18 : f32 to vector<8x128xf32>
    %34 = arith.cmpf ogt, %32, %33 : vector<8x128xf32>
    %cst_19 = arith.constant 0.000000e+00 : f32
    %35 = vector.broadcast %cst_19 : f32 to vector<8x128xf32>
    %36 = arith.minimumf %32, %35 : vector<8x128xf32>
    %37 = math.exp %36 : vector<8x128xf32>
    %cst_20 = arith.constant 1.000000e+00 : f32
    %38 = vector.broadcast %cst_20 : f32 to vector<8x128xf32>
    %39 = arith.subf %37, %38 : vector<8x128xf32>
    %40 = arith.select %34, %32, %39 : vector<8x128xi1>, vector<8x128xf32>
    %41 = arith.truncf %40 : vector<8x128xf32> to vector<8x128xbf16>
    %c2_21 = arith.constant 2 : index
    %c0_22 = arith.constant 0 : index
    %c0_23 = arith.constant 0 : index
    %42 = vector.load %arg2[%c2_21, %c0_22, %c0_23] : memref<4x128x128xbf16, #tpu.memory_space<vmem>>, vector<1x128x128xbf16>
    %43 = vector.shape_cast %42 : vector<1x128x128xbf16> to vector<128x128xbf16>
    %cst_24 = arith.constant dense<0.000000e+00> : vector<8x128xf32>
    %44 = tpu.matmul %41, %43, %cst_24 {dimension_numbers = #tpu.dot_dimension_numbers<[1], [0], [0], [1], [0, 0, 1, 1], [], []>} : vector<8x128xbf16>, vector<128x128xbf16>, vector<8x128xf32> -> vector<8x128xf32>
    %c4 = arith.constant 4 : index
    %c0_25 = arith.constant 0 : index
    %45 = vector.load %arg1[%c4, %c0_25] : memref<6x128xf32, #tpu.memory_space<vmem>>, vector<1x128xf32>
    %46 = vector.broadcast %45 : vector<1x128xf32> to vector<8x128xf32>
    %47 = arith.addf %44, %46 : vector<8x128xf32>
    %cst_26 = arith.constant 0.000000e+00 : f32
    %48 = vector.broadcast %cst_26 : f32 to vector<8x128xf32>
    %49 = arith.cmpf ogt, %47, %48 : vector<8x128xf32>
    %cst_27 = arith.constant 0.000000e+00 : f32
    %50 = vector.broadcast %cst_27 : f32 to vector<8x128xf32>
    %51 = arith.minimumf %47, %50 : vector<8x128xf32>
    %52 = math.exp %51 : vector<8x128xf32>
    %cst_28 = arith.constant 1.000000e+00 : f32
    %53 = vector.broadcast %cst_28 : f32 to vector<8x128xf32>
    %54 = arith.subf %52, %53 : vector<8x128xf32>
    %55 = arith.select %49, %47, %54 : vector<8x128xi1>, vector<8x128xf32>
    %56 = arith.truncf %55 : vector<8x128xf32> to vector<8x128xbf16>
    %c3_29 = arith.constant 3 : index
    %c0_30 = arith.constant 0 : index
    %c0_31 = arith.constant 0 : index
    %57 = vector.load %arg2[%c3_29, %c0_30, %c0_31] : memref<4x128x128xbf16, #tpu.memory_space<vmem>>, vector<1x128x128xbf16>
    %58 = vector.shape_cast %57 : vector<1x128x128xbf16> to vector<128x128xbf16>
    %cst_32 = arith.constant dense<0.000000e+00> : vector<8x128xf32>
    %59 = tpu.matmul %56, %58, %cst_32 {dimension_numbers = #tpu.dot_dimension_numbers<[1], [0], [0], [1], [0, 0, 1, 1], [], []>} : vector<8x128xbf16>, vector<128x128xbf16>, vector<8x128xf32> -> vector<8x128xf32>
    %c5 = arith.constant 5 : index
    %c0_33 = arith.constant 0 : index
    %60 = vector.load %arg1[%c5, %c0_33] : memref<6x128xf32, #tpu.memory_space<vmem>>, vector<1x128xf32>
    %61 = vector.broadcast %60 : vector<1x128xf32> to vector<8x128xf32>
    %62 = arith.addf %59, %61 : vector<8x128xf32>
    %cst_34 = arith.constant -1.000000e+00 : f32
    %cst_35 = arith.constant 1.000000e+00 : f32
    %63 = vector.broadcast %cst_34 : f32 to vector<8x128xf32>
    %64 = arith.maximumf %63, %62 : vector<8x128xf32>
    %65 = vector.broadcast %cst_35 : f32 to vector<8x128xf32>
    %66 = arith.minimumf %65, %64 : vector<8x128xf32>
    %c0_36 = arith.constant 0 : index
    %c0_37 = arith.constant 0 : index
    %67 = vector.load %arg3[%c0_36, %c0_37] : memref<8x128xf32, #tpu.memory_space<vmem>>, vector<8x128xf32>
    tpu.vector_store %arg3[%c0_36, %c0_37], %66 {strides = array<i32>} : memref<8x128xf32, #tpu.memory_space<vmem>>, vector<8x128xf32>,
    return
  }
}

</mosaic_0001>

<bundles_post_ra>
// kernel: tpu_custom_call.1
= control target key start
LH: loop header
LB: loop body
LE: loop exit
PB: predicated region body
PF: predicated region fallthrough
CT: control target
= control target key end

     0   :  { %8 = vsyncpa [#allocation3], 0  ;;  %s884_s0 = inlined_call_operand.hbm [shape: f32[8,32], index: 0, kind: input, shape index: {}]   ;;  %s885_s1 = inlined_call_operand.hbm [shape: f32[6,128], index: 1, kind: input, shape index: {}]   ;;  %s886_s2 = inlined_call_operand.hbm [shape: bf16[4,128,128], index: 2, kind: input, shape index: {}]   ;;  %s887_s3 = inlined_call_operand.hbm [shape: f32[8,128], index: 3, kind: output, shape index: {}]  }
   0x1   :  { %9 = vsyncpa [#allocation6], 0 }
   0x2   :  { %10 = vsyncpa [#allocation4], 0  ;;  %s774_s12 = smov [#allocation5]   ;;  %s775_s14 = smov [#allocation2]  }
   0x3   :  { %s27_s13 = sshll.u32 %s774_s12, 4  ;;  %s17_s15 = sshll.u32 %s775_s14, 4  ;;  %s28_s13 = int_to_ptr.vmem [resolvable:$true] %s27_s13  ;;  %s18_s15 = int_to_ptr.vmem [resolvable:$true] %s17_s15 }
   0x4   :  { %s680_s18 = scalar_lea.hbm %s885_s1, 128 }
   0x5   :  { %p681_p0 = scmp.ne.s32.totalorder %s885_s1, %s680_s18  ;;  %p684_p1 = scmp.lt.u32.totalorder %s680_s18, %s885_s1 }
   0x7   :  { %p686_p2 = pnand %p684_p1, %p681_p0 }
   0x9   :  { %689 = shalt.err (!%p686_p2)
}
   0xa   :  { %s690_s23 = scalar_lea.vmem %s28_s13, 128  ;;  %p695_p4 = scmp.lt.s32.totalorder %s28_s13, %s28_s13 }
   0xb   :  { %p691_p3 = scmp.ne.s32.totalorder %s28_s13, %s690_s23  ;;  %p696_p5 = scmp.lt.s32.totalorder %s690_s23, %s690_s23 }
   0xd   :  { %p697_p6 = por %p696_p5, %p695_p4 }
   0xf   :  { %p698_p7 = pnand %p697_p6, %p691_p3 }
  0x11   :  { %701 = shalt.err (!%p698_p7)
}
  0x12   :  { %30 = dma.hbm_to_vmem [thread:$0]  %s885_s1, 128, %s28_s13, [#allocation6]  }
  0x13   :  { %s702_s28 = scalar_lea.hbm %s884_s0, 128 }
  0x14   :  { %p703_p8 = scmp.ne.s32.totalorder %s884_s0, %s702_s28  ;;  %p706_p9 = scmp.lt.u32.totalorder %s702_s28, %s884_s0 }
  0x16   :  { %p708_p10 = pnand %p706_p9, %p703_p8 }
  0x18   :  { %711 = shalt.err (!%p708_p10)
}
  0x19   :  { %s712_s6 = scalar_lea.vmem %s18_s15, 128  ;;  %p717_p12 = scmp.lt.s32.totalorder %s18_s15, %s18_s15 }
  0x1a   :  { %p713_p11 = scmp.ne.s32.totalorder %s18_s15, %s712_s6  ;;  %p718_p13 = scmp.lt.s32.totalorder %s712_s6, %s712_s6 }
  0x1c   :  { %p719_p0 = por %p718_p13, %p717_p12 }
  0x1e   :  { %p720_p1 = pnand %p719_p0, %p713_p11 }
  0x20   :  { %723 = shalt.err (!%p720_p1)
}
  0x21   :  { %20 = dma.hbm_to_vmem [thread:$0]  %s884_s0, 128, %s18_s15, [#allocation3]  }
  0x22   :  { %s776_s8 = smov [#allocation7]   ;;  %s724_s12 = scalar_lea.hbm %s886_s2, 4096 }
  0x23   :  { %s36_s9 = sshll.u32 %s776_s8, 4  ;;  %p725_p2 = scmp.ne.s32.totalorder %s886_s2, %s724_s12  ;;  %s37_s9 = int_to_ptr.vmem [resolvable:$true] %s36_s9 }
  0x24   :  { %p728_p3 = scmp.lt.u32.totalorder %s724_s12, %s886_s2 }
  0x26   :  { %p730_p4 = pnand %p728_p3, %p725_p2 }
  0x28   :  { %733 = shalt.err (!%p730_p4)
}
  0x29   :  { %s734_s18 = scalar_lea.vmem %s37_s9, 4096  ;;  %p739_p6 = scmp.lt.s32.totalorder %s37_s9, %s37_s9 }
  0x2a   :  { %p735_p5 = scmp.ne.s32.totalorder %s37_s9, %s734_s18  ;;  %p740_p7 = scmp.lt.s32.totalorder %s734_s18, %s734_s18 }
  0x2c   :  { %p741_p8 = por %p740_p7, %p739_p6 }
  0x2e   :  { %p742_p9 = pnand %p741_p8, %p735_p5 }
  0x30   :  { %745 = shalt.err (!%p742_p9)
}
  0x31   :  { %s777_s0 = smov 64   ;;  %s778_s15 = smov 4  }
  0x32   :  { %42 = dma.hbm_to_vmem [thread:$0]  %s886_s2, 4096, %s37_s9, [#allocation6], %s777_s0, %s777_s0, %s778_s15  }
  0x33   :  { %768 = dma.done.wait [#allocation3], 128  }
  0x34   :  { %769 = vsyncadd [#allocation3], 4294967168 }
  0x35   :  { %770 = dma.done.wait [#allocation6], 4224  }
  0x36   :  { %771 = vsyncadd [#allocation6], 4294963072  ;;  %v779_v0 = vmov 0.0   ;;  %vm780_vm0 = vmmov 0   ;;  %v648_v1 = vld [vmem:[#allocation7] sm:$0xff]   ;;  %v649_v2 = vld [vmem:[#allocation7 + $0x8] sm:$0xff]  }
  0x37   :  { %572 = vmatprep.subr.bf16.mxu0 %v779_v0  ;;  %576 = vmatprep.mubr.msk.bf16.mxu0 %vm780_vm0, %v779_v0  ;;  %v53_v3 = vld [vmem:[#allocation2] sm:$0xff]  ;;  %v504_v4 = vld [vmem:[#allocation5] ss:$0 sm:$0xff]  ;;  %v505_v5 = vld [vmem:[#allocation5 + $0x1] ss:$0 sm:$0xff]  ;;  %vm90_vm1 = vcmask 261120  }
  0x38   :  { %580 = vmatprep.subr.bf16.mxu1 %v779_v0  ;;  %596 = vmatprep.mubr.msk.bf16.mxu1 %vm780_vm0, %v779_v0  ;;  %v60_v6 = vmul.f32 %v504_v4, %v53_v3  ;;  %v650_v7 = vld [vmem:[#allocation7 + $0x40] sm:$0xff]   ;;  %v651_v9 = vld [vmem:[#allocation7 + $0x48] sm:$0xff]   ;;  %v652_v12 = vld [vmem:[#allocation7 + $0x50] sm:$0xff]   ;;  %s781_s2 = smov [#allocation8]  }
  0x39   :  { %573 = vmatpush3.bf16.msra.mxu0 %v648_v1  ;;  %581 = vmatpush3.bf16.msra.mxu1 %v650_v7  ;;  %v653_v13 = vld [vmem:[#allocation7 + $0x58] sm:$0xff]   ;;  %v654_v14 = vld [vmem:[#allocation7 + $0x60] sm:$0xff]   ;;  %v655_v15 = vld [vmem:[#allocation7 + $0x68] sm:$0xff]   ;;  %s494_s21 = sshll.u32 %s781_s2, 4  ;;  %s495_s21 = int_to_ptr.vmem [resolvable:$true] %s494_s21 }
  0x3a   :  { %574 = vmatprep.subr.bf16.mxu0 %v779_v0  ;;  %v65_v8 = vadd.f32 %v505_v5, %v60_v6  ;;  %582 = vmatprep.subr.bf16.mxu1 %v779_v0  ;;  %v656_v16 = vld [vmem:[#allocation7 + $0x70] sm:$0xff]   ;;  %v657_v17 = vld [vmem:[#allocation7 + $0x78] sm:$0xff]   ;;  %v658_v18 = vld [vmem:[#allocation7 + $0x80] sm:$0xff]   ;;  %s746_s22 = scalar_lea.vmem %s495_s21, 128  ;;  %p751_p11 = scmp.lt.s32.totalorder %s495_s21, %s495_s21 }
  0x3b   :  { %v659_v19 = vld [vmem:[#allocation7 + $0x88] sm:$0xff]   ;;  %v507_v20 = vld [vmem:[#allocation5 + $0x2] ss:$0 sm:$0xff]  ;;  %v660_v32 = vld [vmem:[#allocation7 + $0x90] sm:$0xff]   ;;  %p747_p10 = scmp.ne.s32.totalorder %s495_s21, %s746_s22  ;;  %p752_p12 = scmp.lt.s32.totalorder %s746_s22, %s746_s22 }
  0x3c   :  { %v506_v10 = vclamps-f32 %v65_v8, 5.0  ;;  %v661_v33 = vld [vmem:[#allocation7 + $0x98] sm:$0xff]   ;;  %v662_v34 = vld [vmem:[#allocation7 + $0xa0] sm:$0xff]   ;;  %v663_v35 = vld [vmem:[#allocation7 + $0xa8] sm:$0xff]  }
  0x3d   :  { %575 = vmatpush3.bf16.msra.mxu0 %v649_v2  ;;  %583 = vmatpush3.bf16.msra.mxu1 %v651_v9  ;;  %v664_v36 = vld [vmem:[#allocation7 + $0xb0] sm:$0xff]   ;;  %v665_v37 = vld [vmem:[#allocation7 + $0xb8] sm:$0xff]   ;;  %v666_v38 = vld [vmem:[#allocation7 + $0xc0] sm:$0xff]   ;;  %p753_p13 = por %p752_p12, %p751_p11 }
  0x3e   :  { %600 = vmatprep.subr.bf16.mxu0 %v779_v0  ;;  %v72_v11 = vpack.c.bf16 %v506_v10, %v506_v10  ;;  %584 = vmatprep.subr.bf16.mxu1 %v779_v0  ;;  %v667_v39 = vld [vmem:[#allocation7 + $0xc8] sm:$0xff]   ;;  %v512_v40 = vld [vmem:[#allocation5 + $0x3] ss:$0 sm:$0xff]  ;;  %v668_v52 = vld [vmem:[#allocation7 + $0xd0] sm:$0xff]  }
  0x3f   :  { %v669_v53 = vld [vmem:[#allocation7 + $0xd8] sm:$0xff]   ;;  %v670_v54 = vld [vmem:[#allocation7 + $0xe0] sm:$0xff]   ;;  %v671_v55 = vld [vmem:[#allocation7 + $0xe8] sm:$0xff]   ;;  %p754_p0 = pnand %p753_p13, %p747_p10 }
  0x40   :  { %577 = vmatmul.mubr.msk.bf16.vlgmr.msra.gmra.mrb[0].mxu0 %vm90_vm1, %v72_v11  ;;  %v672_v56 = vld [vmem:[#allocation7 + $0xf0] sm:$0xff]   ;;  %v673_v57 = vld [vmem:[#allocation7 + $0xf8] sm:$0xff]  }
  0x41   :  { %616 = vmatprep.mubr.msk.bf16.mxu0 %vm780_vm0, %v779_v0  ;;  %585 = vmatpush3.bf16.msra.mxu1 %v652_v12  ;;  %v522_v58 = vld [vmem:[#allocation5 + $0x4] ss:$0 sm:$0xff]  ;;  %v532_v7 = vld [vmem:[#allocation5 + $0x5] ss:$0 sm:$0xff] }
  0x42   :  { %586 = vmatprep.subr.bf16.mxu1 %v779_v0  ;;  %601 = vmatpush3.bf16.msra.mxu0 %v658_v18 }
  0x43   :  { %602 = vmatprep.subr.bf16.mxu0 %v779_v0 }
  0x45   :  { %587 = vmatpush3.bf16.msra.mxu1 %v653_v13 }
  0x46   :  { %588 = vmatprep.subr.bf16.mxu1 %v779_v0  ;;  %603 = vmatpush3.bf16.msra.mxu0 %v659_v19 }
  0x47   :  { %604 = vmatprep.subr.bf16.mxu0 %v779_v0 }
  0x49   :  { %589 = vmatpush3.bf16.msra.mxu1 %v654_v14 }
  0x4a   :  { %590 = vmatprep.subr.bf16.mxu1 %v779_v0  ;;  %605 = vmatpush3.bf16.msra.mxu0 %v660_v32 }
  0x4b   :  { %606 = vmatprep.subr.bf16.mxu0 %v779_v0 }
  0x4d   :  { %591 = vmatpush3.bf16.msra.mxu1 %v655_v15 }
  0x4e   :  { %592 = vmatprep.subr.bf16.mxu1 %v779_v0  ;;  %607 = vmatpush3.bf16.msra.mxu0 %v661_v33 }
  0x4f   :  { %608 = vmatprep.subr.bf16.mxu0 %v779_v0 }
  0x51   :  { %593 = vmatpush3.bf16.msra.mxu1 %v656_v16 }
  0x52   :  { %594 = vmatprep.subr.bf16.mxu1 %v779_v0  ;;  %609 = vmatpush3.bf16.msra.mxu0 %v662_v34 }
  0x53   :  { %610 = vmatprep.subr.bf16.mxu0 %v779_v0 }
  0x55   :  { %595 = vmatpush3.bf16.msra.mxu1 %v657_v17 }
  0x56   :  { %620 = vmatprep.subr.bf16.mxu1 %v779_v0  ;;  %611 = vmatpush3.bf16.msra.mxu0 %v663_v35 }
  0x57   :  { %612 = vmatprep.subr.bf16.mxu0 %v779_v0 }
  0x5a   :  { %613 = vmatpush3.bf16.msra.mxu0 %v664_v36 }
  0x5b   :  { %614 = vmatprep.subr.bf16.mxu0 %v779_v0 }
  0x5e   :  { %615 = vmatpush3.bf16.msra.mxu0 %v665_v37 }
 0x113   :  { %v128_v21 = vpop.f32.mrb[0].mxu0 }
 0x114   :  { %v129_v22 = vadd.f32 %v507_v20, %v128_v21  ;;  %v578_v23 = vpop.f32.mrb[1].mxu0 }
 0x115   :  { %v131_v24 = vpop.f32.mrb[2].mxu0 }
 0x116   :  { %v135_v25 = vmin.f32 %v129_v22, 0.0  ;;  %v579_v26 = vpop.f32.mrb[3].mxu0  ;;  %vm134_vm2 = vcmp.gt.f32.partialorder %v129_v22, 0.0 }
 0x118   :  { %v136_v27 = vmul.f32 1.442695, %v135_v25 }
 0x11a   :  { %674 = vpow2.f32 %v136_v27 }
 0x124   :  { %v675_v28 = vpop.eup %674 }
 0x125   :  { %v511_v29 = vadd.f32 -1.0, %v675_v28 }
 0x127   :  { %v139_v30 = vsel %vm134_vm2, %v129_v22, %v511_v29 }
 0x128   :  { %v140_v31 = vpack.c.bf16 %v139_v30, %v139_v30 }
 0x12a   :  { %597 = vmatmul.mubr.bf16.vlgmr.msra.gmra.mrb[0].mxu1 %v140_v31 }
 0x12b   :  { %636 = vmatprep.mubr.msk.bf16.mxu1 %vm780_vm0, %v779_v0  ;;  %621 = vmatpush3.bf16.msra.mxu1 %v666_v38 }
 0x12c   :  { %622 = vmatprep.subr.bf16.mxu1 %v779_v0 }
 0x12f   :  { %623 = vmatpush3.bf16.msra.mxu1 %v667_v39 }
 0x130   :  { %624 = vmatprep.subr.bf16.mxu1 %v779_v0 }
 0x133   :  { %625 = vmatpush3.bf16.msra.mxu1 %v668_v52 }
 0x134   :  { %626 = vmatprep.subr.bf16.mxu1 %v779_v0 }
 0x137   :  { %627 = vmatpush3.bf16.msra.mxu1 %v669_v53 }
 0x138   :  { %628 = vmatprep.subr.bf16.mxu1 %v779_v0 }
 0x13b   :  { %629 = vmatpush3.bf16.msra.mxu1 %v670_v54 }
 0x13c   :  { %630 = vmatprep.subr.bf16.mxu1 %v779_v0 }
 0x13f   :  { %631 = vmatpush3.bf16.msra.mxu1 %v671_v55 }
 0x140   :  { %632 = vmatprep.subr.bf16.mxu1 %v779_v0 }
 0x143   :  { %633 = vmatpush3.bf16.msra.mxu1 %v672_v56 }
 0x144   :  { %634 = vmatprep.subr.bf16.mxu1 %v779_v0 }
 0x147   :  { %635 = vmatpush3.bf16.msra.mxu1 %v673_v57 }
 0x1fd   :  { %v245_v41 = vpop.f32.mrb[0].mxu1 }
 0x1fe   :  { %v246_v42 = vadd.f32 %v512_v40, %v245_v41  ;;  %v598_v43 = vpop.f32.mrb[1].mxu1 }
 0x1ff   :  { %v248_v44 = vpop.f32.mrb[2].mxu1 }
 0x200   :  { %v252_v45 = vmin.f32 %v246_v42, 0.0  ;;  %v599_v46 = vpop.f32.mrb[3].mxu1  ;;  %vm251_vm3 = vcmp.gt.f32.partialorder %v246_v42, 0.0 }
 0x202   :  { %v253_v47 = vmul.f32 1.442695, %v252_v45 }
 0x204   :  { %676 = vpow2.f32 %v253_v47 }
 0x20e   :  { %v677_v48 = vpop.eup %676 }
 0x20f   :  { %v521_v49 = vadd.f32 -1.0, %v677_v48 }
 0x211   :  { %v256_v50 = vsel %vm251_vm3, %v246_v42, %v521_v49 }
 0x212   :  { %v257_v51 = vpack.c.bf16 %v256_v50, %v256_v50 }
 0x214   :  { %617 = vmatmul.mubr.bf16.vlgmr.msra.gmra.mrb[4].mxu0 %v257_v51 }
 0x2e7   :  { %v362_v59 = vpop.f32.mrb[4].mxu0 }
 0x2e8   :  { %v363_v60 = vadd.f32 %v522_v58, %v362_v59  ;;  %v618_v61 = vpop.f32.mrb[5].mxu0 }
 0x2e9   :  { %v365_v62 = vpop.f32.mrb[6].mxu0 }
 0x2ea   :  { %v369_v63 = vmin.f32 %v363_v60, 0.0  ;;  %v619_v1 = vpop.f32.mrb[7].mxu0  ;;  %vm368_vm4 = vcmp.gt.f32.partialorder %v363_v60, 0.0 }
 0x2ec   :  { %v370_v2 = vmul.f32 1.442695, %v369_v63 }
 0x2ee   :  { %678 = vpow2.f32 %v370_v2 }
 0x2f8   :  { %v679_v3 = vpop.eup %678 }
 0x2f9   :  { %v531_v4 = vadd.f32 -1.0, %v679_v3 }
 0x2fb   :  { %v373_v5 = vsel %vm368_vm4, %v363_v60, %v531_v4 }
 0x2fc   :  { %v374_v6 = vpack.c.bf16 %v373_v5, %v373_v5 }
 0x2fe   :  { %637 = vmatmul.mubr.bf16.vlgmr.msra.gmra.mrb[4].mxu1 %v374_v6 }
 0x3d1   :  { %v479_v8 = vpop.f32.mrb[4].mxu1 }
 0x3d2   :  { %v480_v0 = vadd.f32 %v532_v7, %v479_v8  ;;  %v638_v9 = vpop.f32.mrb[5].mxu1 }
 0x3d3   :  { %v482_v10 = vpop.f32.mrb[6].mxu1 }
 0x3d4   :  { %v541_v11 = vclamps-f32 %v480_v0, 1.0  ;;  %v639_v12 = vpop.f32.mrb[7].mxu1 }
 0x3d6   :  { %487 = vst [vmem:[#allocation8] sm:$0xff] %v541_v11 }
 0x3d7   :  { %757 = shalt.err (!%p754_p0)
}
 0x3d8   :  { %s758_s25 = scalar_lea.hbm %s887_s3, 128 }
 0x3d9   :  { %p759_p1 = scmp.ne.s32.totalorder %s887_s3, %s758_s25  ;;  %p762_p2 = scmp.lt.u32.totalorder %s758_s25, %s887_s3 }
 0x3db   :  { %p764_p3 = pnand %p762_p2, %p759_p1 }
 0x3dd   :  { %767 = shalt.err (!%p764_p3)
}
 0x3de   :  { %497 = dma.vmem_to_hbm [thread:$0]  %s495_s21, 128, %s887_s3, [#allocation4]  }
 0x3df   :  { %772 = dma.done.wait [#allocation4], 128  }
 0x3e0   :  { %773 = vsyncadd [#allocation4], 4294967168 }
 0x3e1   :  { %501 = vsyncpa [#allocation3], 1 }
 0x3e2   :  { %502 = vsyncpa [#allocation6], 1 }
 0x3e3   :  { %503 = vsyncpa [#allocation4], 1 }

</bundles_post_ra>
